<compile_context>
chip_gen: v5e
topology: v5e:2x2
jax: 0.10.0
libtpu: 0.0.40
codegen_flags: <defaults>
</compile_context>

<pallas_src>
import functools

import jax
import jax.numpy as jnp
from jax.experimental import pallas as pl
from jax.experimental.pallas import tpu as pltpu


# Rows of (B*NP) per grid step.  512-1024 row tiles measure ~85% of the HBM
# roofline on v6e for mem-bound streaming; VMEM footprint per step is tiny.
DEFAULT_TILE_M = 512


# ----------------------------- Pallas kernel -------------------------------


def _pc_layer_kernel(patches_ref, r_ref, u_ref, out_ref):
    """One M-tile of patch rows.

    patches_ref: (TILE_M, K)    compute dtype (bf16 on the production path)
    r_ref:       (TILE_M, NCp)  compute dtype
    u_ref:       (NCp, K)       compute dtype (whole array, tiny, resident)
    out_ref:     (1, 2, K)      f32 per-tile partials:
                                row 0 = per-lane sum(err^2)
                                row 1 = per-lane sum(|err|)
    """
    r = r_ref[...]
    u = u_ref[...]
    patches = patches_ref[...].astype(jnp.float32)

    # prediction = tanh(r @ U_flat): MXU matmul with f32 accumulation, EUP tanh.
    pred = jnp.tanh(jnp.dot(r, u, preferred_element_type=jnp.float32))
    err = patches - pred                                   # f32

    # Sublane-only partial reductions; the 128-lane collapse and the cross-tile
    # sum happen in XLA on the (num_tiles, 2, K) partial outputs.
    sq = jnp.sum(err * err, axis=0, keepdims=True)         # (1, K)
    ab = jnp.sum(jnp.abs(err), axis=0, keepdims=True)      # (1, K)
    out_ref[:, 0:1, :] = sq[None]
    out_ref[:, 1:2, :] = ab[None]


# ------------------------------- glue (JAX) ---------------------------------


def _round_up(n, m):
    return -(-n // m) * m


@functools.partial(jax.jit, static_argnames=("kernel_size", "stride", "sigma2",
                                             "alpha", "lam", "compute_dtype",
                                             "tile_m"))
def predictive_coding_layer_forward(x, U, r, *, kernel_size, stride, sigma2,
                                    alpha, lam, compute_dtype="bfloat16",
                                    tile_m=DEFAULT_TILE_M):
    """x: (B, C, H, W), U: (n_causes, C, kh, kw), r: (B, n_causes, nph, npw)."""
    cdt = jnp.dtype(compute_dtype)
    B, C, H, W = x.shape
    kh, kw = kernel_size
    sh, sw = stride
    n_causes = U.shape[0]
    nph = (H - kh) // sh + 1
    npw = (W - kw) // sw + 1
    NP = nph * npw
    K = C * kh * kw
    M = B * NP

    # nn.Unfold as a single XLA op.  Output feature ordering is channel-major
    # (C, kh, kw), identical to torch.nn.Unfold (guarded by the reference
    # check in __main__).
    patches = jax.lax.conv_general_dilated_patches(
        x.astype(jnp.float32), (kh, kw), (sh, sw), "VALID")      # (B, K, nph, npw)
    # Cast to the (narrow) compute dtype BEFORE the layout passes so the
    # transpose/reshape/pad move half the bytes.  No K zero-pad: the lane dim
    # equals the full array dim K, which is BlockSpec-legal.
    patches = patches.reshape(B, K, NP).astype(cdt)
    patches = jnp.transpose(patches, (0, 2, 1)).reshape(M, K)    # (M, K)

    # r[b, cause, ph, pw] -> (M, NC);  U -> (NC, K)
    r_flat = jnp.transpose(r.reshape(B, n_causes, NP), (0, 2, 1)).reshape(M, n_causes)
    u_flat = U.reshape(n_causes, K)

    # Tiling / padding.  Zero padding is exact: tanh(0) = 0 and zero-padded
    # patch rows / cause columns contribute nothing to the error sums.
    tm = min(tile_m, _round_up(M, 8))      # clamp for tiny problems
    Mp = _round_up(M, tm)
    num_tiles = Mp // tm
    NCp = _round_up(n_causes, 16)          # bf16 packs 16 rows per sublane tile

    patches_p = jnp.pad(patches, ((0, Mp - M), (0, 0)))
    r_p = jnp.pad(r_flat.astype(cdt), ((0, Mp - M), (0, NCp - n_causes)))
    u_p = jnp.pad(u_flat.astype(cdt), ((0, NCp - n_causes), (0, 0)))

    itemsize = jnp.dtype(cdt).itemsize
    cost = pl.CostEstimate(
        flops=2 * Mp * NCp * K,
        transcendentals=Mp * K,
        bytes_accessed=(patches_p.size + r_p.size + u_p.size) * itemsize
        + num_tiles * 2 * K * 4,
    )

    partial = pl.pallas_call(
        _pc_layer_kernel,
        out_shape=jax.ShapeDtypeStruct((num_tiles, 2, K), jnp.float32),
        grid_spec=pltpu.PrefetchScalarGridSpec(
            num_scalar_prefetch=0,
            grid=(num_tiles,),
            in_specs=[
                pl.BlockSpec((tm, K), lambda i: (i, 0)),       # patches (streamed)
                pl.BlockSpec((tm, NCp), lambda i: (i, 0)),     # r       (streamed)
                pl.BlockSpec((NCp, K), lambda i: (0, 0)),      # U       (resident)
            ],
            out_specs=pl.BlockSpec((1, 2, K), lambda i: (i, 0, 0)),
        ),
        compiler_params=pltpu.CompilerParams(
            # Per-tile partial outputs are disjoint -> safe to shard the M axis
            # across v7x's two TensorCores; no-op on v5e/v6e single-TC.
            dimension_semantics=("parallel",),
            # Explicit limit (v5e default scoped is only 16 MiB); per-step
            # double-buffered tiles here are well under 1 MiB.
            vmem_limit_bytes=32 * 1024 * 1024,
        ),
        cost_estimate=cost,
    )(patches_p, r_p, u_p)

    sq = jnp.sum(partial[:, 0, :])        # sum(err^2)
    abs_sum = jnp.sum(partial[:, 1, :])   # sum(|err|)

    reconstruction_loss = (1.0 / sigma2) * sq
    mean_abs_error = abs_sum / (B * NP * K)          # unpadded element count
    # Batch-independent / tiny priors: computed (and fused) by XLA outside.
    u_prior_loss = lam * jnp.mean(jnp.square(U.astype(jnp.float32)))
    r_prior_loss = alpha * jnp.mean(jnp.square(r.astype(jnp.float32)))
    total_loss = reconstruction_loss + u_prior_loss + r_prior_loss

    losses = {
        "reconstruction_loss": reconstruction_loss,
        "mean_abs_error": mean_abs_error,
        "U_prior_loss": u_prior_loss,
        "r_prior_loss": r_prior_loss,
        "total_loss": total_loss,
    }
    # forward() returns r (already shaped (B, n_causes, nph, npw))
    return r, losses


# --------------------------- reference (plain JAX) ---------------------------


def _unfold_nchw_loop(x, kh, kw, sh, sw):
    """Torch-faithful unfold via explicit slicing (reference only)."""
    B, C, H, W = x.shape
    nph = (H - kh) // sh + 1
    npw = (W - kw) // sw + 1
    rows = []
    for i in range(nph):
        for j in range(npw):
            patch = x[:, :, i * sh:i * sh + kh, j * sw:j * sw + kw]
            rows.append(patch.reshape(B, C * kh * kw))
    return jnp.stack(rows, axis=1), nph, npw  # (B, NP, K)


def _reference_forward(x, U, r, kernel_size, stride, sigma2, alpha, lam):
    B, C, H, W = x.shape
    kh, kw = kernel_size
    sh, sw = stride
    patches, nph, npw = _unfold_nchw_loop(x, kh, kw, sh, sw)
    NP = nph * npw
    r_flat = jnp.transpose(r.reshape(B, r.shape[1], NP), (0, 2, 1))
    u_flat = U.reshape(U.shape[0], C * kh * kw)
    pred = jnp.tanh(jnp.einsum("bpc,ck->bpk", r_flat, u_flat,
                               precision=jax.lax.Precision.HIGHEST))
    err = patches - pred
    recon = (1.0 / sigma2) * jnp.sum(err * err)
    mae = jnp.mean(jnp.abs(err))
    u_prior = lam * jnp.mean(U * U)
    r_prior = alpha * jnp.mean(r * r)
    return recon, mae, u_prior, r_prior, recon + u_prior + r_prior


# ---------------------------------- main -------------------------------------


if __name__ == "__main__":
    # Layer-0 configuration from the PredictiveCodingNetwork in the reference:
    #   input_size=(3, 16, 16), n_causes=20, kernel_size=(5, 5), stride=3,
    #   padding=0, lam=0.1, alpha=0.1, sigma2=10.0
    B, C, H, W = 2, 3, 16, 16
    n_causes = 20
    kernel_size = (5, 5)
    stride = (3, 3)
    sigma2, alpha, lam = 10.0, 0.1, 0.1

    kh, kw = kernel_size
    sh, sw = stride
    nph = (H - kh) // sh + 1
    npw = (W - kw) // sw + 1

    key = jax.random.PRNGKey(0)
    kx, ku, kr = jax.random.split(key, 3)

    x = jax.random.normal(kx, (B, C, H, W), dtype=jnp.float32)
    # U ~ randn(n_causes, C, kh, kw)  (deterministic synthetic init)
    U = jax.random.normal(ku, (n_causes, C, kh, kw), dtype=jnp.float32)
    # r init matches PredictiveCodingNetwork.forward: uniform, normalized over causes
    r = jax.random.uniform(kr, (B, n_causes, nph, npw), dtype=jnp.float32)
    r = r / jnp.sum(r, axis=1, keepdims=True)

    # TODO(synk): the network-level inference loop (iterative r/U gradient
    # updates, fold-based prediction reassembly) is outside this layer's
    # forward pass and is not implemented here.

    # Production path: bf16-streamed operands, f32 error/reductions.
    r_out, losses = predictive_coding_layer_forward(
        x, U, r, kernel_size=kernel_size, stride=stride,
        sigma2=sigma2, alpha=alpha, lam=lam)
    r_out = jax.block_until_ready(r_out)
    losses = jax.tree_util.tree_map(jax.block_until_ready, losses)

    # Pure-JAX f32 reference (also guards the conv_general_dilated_patches
    # channel-major feature ordering against nn.Unfold).
    recon_ref, mae_ref, up_ref, rp_ref, tot_ref = _reference_forward(
        x, U, r, kernel_size, stride, sigma2, alpha, lam)

    # bf16 streaming path: intentionally widened tolerances (documented).
    assert jnp.allclose(losses["reconstruction_loss"], recon_ref, rtol=2e-2, atol=1e-2)
    assert jnp.allclose(losses["mean_abs_error"], mae_ref, rtol=2e-2, atol=1e-3)
    assert jnp.allclose(losses["U_prior_loss"], up_ref, rtol=1e-5, atol=1e-7)
    assert jnp.allclose(losses["r_prior_loss"], rp_ref, rtol=1e-5, atol=1e-8)
    assert jnp.allclose(losses["total_loss"], tot_ref, rtol=2e-2, atol=1e-2)
    assert r_out.shape == (B, n_causes, nph, npw)

    # f32 fallback path: tight-tolerance validation of the same kernel.
    _, losses_f32 = predictive_coding_layer_forward(
        x, U, r, kernel_size=kernel_size, stride=stride,
        sigma2=sigma2, alpha=alpha, lam=lam, compute_dtype="float32")
    losses_f32 = jax.tree_util.tree_map(jax.block_until_ready, losses_f32)
    assert jnp.allclose(losses_f32["reconstruction_loss"], recon_ref, rtol=5e-3, atol=1e-3)
    assert jnp.allclose(losses_f32["mean_abs_error"], mae_ref, rtol=5e-3, atol=1e-4)
    assert jnp.allclose(losses_f32["total_loss"], tot_ref, rtol=5e-3, atol=1e-3)

    print("KERNEL_OK")
</pallas_src>

<mosaic_0001>
module attributes {stable_mosaic.version = 11 : i64} {
  func.func @_pc_layer_kernel(%arg0: i32, %arg1: memref<32x75xbf16, #tpu.memory_space<vmem>>, %arg2: memref<32x32xbf16, #tpu.memory_space<vmem>>, %arg3: memref<32x75xbf16, #tpu.memory_space<vmem>>, %arg4: memref<1x2x75xf32, #tpu.memory_space<vmem>>) attributes {dimension_semantics = [#tpu.dimension_semantics<parallel>], iteration_bounds = array<i64: 1>, scalar_prefetch = 0 : i64, scratch_operands = 0 : i64, tpu.core_type = #tpu.core_type<tc>, window_params = [{transform_indices = @transform_0, window_bounds = array<i64: 32, 75>}, {transform_indices = @transform_1, window_bounds = array<i64: 32, 32>}, {pipeline_mode = #tpu.pipeline_mode<synchronous>, transform_indices = @transform_2, window_bounds = array<i64: 32, 75>}, {transform_indices = @transform_3, window_bounds = array<i64: 1, 2, 75>}]} {
    %c0 = arith.constant 0 : index
    %c0_0 = arith.constant 0 : index
    %0 = vector.load %arg2[%c0, %c0_0] : memref<32x32xbf16, #tpu.memory_space<vmem>>, vector<32x32xbf16>
    %c0_1 = arith.constant 0 : index
    %c0_2 = arith.constant 0 : index
    %1 = vector.load %arg3[%c0_1, %c0_2] : memref<32x75xbf16, #tpu.memory_space<vmem>>, vector<32x75xbf16>
    %c0_3 = arith.constant 0 : index
    %c0_4 = arith.constant 0 : index
    %2 = vector.load %arg1[%c0_3, %c0_4] : memref<32x75xbf16, #tpu.memory_space<vmem>>, vector<32x75xbf16>
    %3 = arith.extf %2 : vector<32x75xbf16> to vector<32x75xf32>
    %cst = arith.constant dense<0.000000e+00> : vector<32x75xf32>
    %4 = tpu.matmul %0, %1, %cst {dimension_numbers = #tpu.dot_dimension_numbers<[1], [0], [0], [1], [0, 0, 1, 1], [], []>} : vector<32x32xbf16>, vector<32x75xbf16>, vector<32x75xf32> -> vector<32x75xf32>
    %5 = math.tanh %4 : vector<32x75xf32>
    %6 = arith.subf %3, %5 : vector<32x75xf32>
    %7 = arith.mulf %6, %6 : vector<32x75xf32>
    %cst_5 = arith.constant dense<0.000000e+00> : vector<75xf32>
    %8 = vector.multi_reduction <add>, %7, %cst_5 [0] : vector<32x75xf32> to vector<75xf32>
    %9 = vector.shape_cast %8 : vector<75xf32> to vector<1x75xf32>
    %10 = math.absf %6 : vector<32x75xf32>
    %cst_6 = arith.constant dense<0.000000e+00> : vector<75xf32>
    %11 = vector.multi_reduction <add>, %10, %cst_6 [0] : vector<32x75xf32> to vector<75xf32>
    %12 = vector.shape_cast %11 : vector<75xf32> to vector<1x75xf32>
    %13 = vector.shape_cast %9 : vector<1x75xf32> to vector<1x1x75xf32>
    %c0_7 = arith.constant 0 : index
    %c0_8 = arith.constant 0 : index
    %c0_9 = arith.constant 0 : index
    %14 = vector.load %arg4[%c0_7, %c0_8, %c0_9] : memref<1x2x75xf32, #tpu.memory_space<vmem>>, vector<1x1x75xf32>
    tpu.vector_store %arg4[%c0_7, %c0_8, %c0_9], %13 {strides = array<i32>} : memref<1x2x75xf32, #tpu.memory_space<vmem>>, vector<1x1x75xf32>,
    %15 = vector.shape_cast %12 : vector<1x75xf32> to vector<1x1x75xf32>
    %c0_10 = arith.constant 0 : index
    %c1 = arith.constant 1 : index
    %c0_11 = arith.constant 0 : index
    %16 = vector.load %arg4[%c0_10, %c1, %c0_11] : memref<1x2x75xf32, #tpu.memory_space<vmem>>, vector<1x1x75xf32>
    tpu.vector_store %arg4[%c0_10, %c1, %c0_11], %15 {strides = array<i32>} : memref<1x2x75xf32, #tpu.memory_space<vmem>>, vector<1x1x75xf32>,
    return
  }
  func.func @transform_0(%arg0: i32) -> (i32, i32) {
    %c0_i32 = arith.constant 0 : i32
    %c0_i32_0 = arith.constant 0 : i32
    return %arg0, %c0_i32 : i32, i32
  }
  func.func @transform_1(%arg0: i32) -> (i32, i32) {
    %c0_i32 = arith.constant 0 : i32
    %c0_i32_0 = arith.constant 0 : i32
    return %arg0, %c0_i32 : i32, i32
  }
  func.func @transform_2(%arg0: i32) -> (i32, i32) {
    %c0_i32 = arith.constant 0 : i32
    %c0_i32_0 = arith.constant 0 : i32
    %c0_i32_1 = arith.constant 0 : i32
    return %c0_i32, %c0_i32_0 : i32, i32
  }
  func.func @transform_3(%arg0: i32) -> (i32, i32, i32) {
    %c0_i32 = arith.constant 0 : i32
    %c0_i32_0 = arith.constant 0 : i32
    %c0_i32_1 = arith.constant 0 : i32
    return %arg0, %c0_i32, %c0_i32_0 : i32, i32, i32
  }
}

</mosaic_0001>

<bundles_post_ra>
// kernel: predictive_coding_layer_forward.1
= control target key start
LH: loop header
LB: loop body
LE: loop exit
PB: predicated region body
PF: predicated region fallthrough
CT: control target
= control target key end

     0   :  { %vm53_vm0 = vcmask 261120   ;;  %vm91_vm1 = vcmask 613376   ;;  %vm122_vm2 = vcmask 606208   ;;  %s222_s2 = inlined_call_operand.vmem [shape: bf16[32,75], index: 2, kind: input, shape index: {}]   ;;  %s223_s1 = inlined_call_operand.vmem [shape: bf16[32,32], index: 1, kind: input, shape index: {}]   ;;  %s224_s0 = inlined_call_operand.vmem [shape: bf16[32,75], index: 0, kind: input, shape index: {}]   ;;  %s225_s3 = inlined_call_operand.vmem [shape: f32[1,2,75], index: 3, kind: output, shape index: {}]  }
   0x1   :  { %v150_v0 = vld [vmem:[%s222_s2 + $0x8] sm:$0xff]  ;;  %v149_v1 = vld [vmem:[%s222_s2] sm:$0xff] }
   0x2   :  { %66 = vmatpush.bf16.msra.mxu0 %v150_v0  ;;  %160 = vmatpush.bf16.msra.mxu1 %v150_v0  ;;  %v147_v2 = vld [vmem:[%s223_s1] sm:$0xff]  ;;  %v148_v3 = vld [vmem:[%s223_s1 + $0x8] sm:$0xff] }
   0x3   :  { %v152_v6 = vld [vmem:[%s224_s0] sm:$0xff]   ;;  %v159_v8 = vld [vmem:[%s224_s0 + $0x8] sm:$0xff]  }
   0x4   :  { %v153_v7 = vunpack.c.l.bf16 %v152_v6  ;;  %v157_v12 = vunpack.c.l.bf16 %v159_v8  ;;  %v154_v15 = vunpack.c.h.bf16 %v152_v6  ;;  %v158_v16 = vunpack.c.h.bf16 %v159_v8 }
   0x6   :  { %67 = vmatpush.bf16.msra.mxu0 %v149_v1  ;;  %161 = vmatpush.bf16.msra.mxu1 %v149_v1 }
   0x9   :  { %145 = vmatmul.msk.bf16.vlgmr.msra.gmra.mxu0 %vm53_vm0, %v147_v2  ;;  %146 = vmatmul.msk.bf16.vlgmr.msra.gmra.mxu1 %vm53_vm0, %v148_v3 }
  0x86   :  { %v69_v4 = vpop.f32.mrf.mxu0  ;;  %v74_v5 = vpop.f32.mrf.mxu1 }
  0x87   :  { %162 = vtanh.f32 %v69_v4 }
  0x88   :  { %164 = vtanh.f32 %v74_v5 }
  0x8d   :  { %v163_v9 = vpop.eup %162 }
  0x8e   :  { %v71_v10 = vpop.f32.mrf.mxu0  ;;  %v76_v11 = vpop.f32.mrf.mxu1  ;;  %v83_v14 = vsub.f32 %v153_v7, %v163_v9 }
  0x8f   :  { %166 = vtanh.f32 %v71_v10  ;;  %v165_v13 = vpop.eup %164 }
  0x90   :  { %168 = vtanh.f32 %v76_v11  ;;  %v85_v17 = vsub.f32 %v157_v12, %v165_v13  ;;  %v87_v19 = vmul.f32 %v83_v14, %v83_v14  ;;  %v105_v20 = vand.u32 2147483647, %v83_v14 }
  0x92   :  { %v89_v24 = vmul.f32 %v85_v17, %v85_v17  ;;  %v107_v25 = vand.u32 2147483647, %v85_v17  ;;  %v92_v28 = vsel %vm91_vm1, %v87_v19, 0.0  ;;  %v109_v29 = vsel %vm91_vm1, %v105_v20, 0.0 }
  0x94   :  { %v95_v36 = vsel %vm91_vm1, %v89_v24, 0.0  ;;  %v112_v37 = vsel %vm91_vm1, %v107_v25, 0.0 }
  0x95   :  { %v167_v18 = vpop.eup %166 }
  0x96   :  { %v169_v21 = vpop.eup %168  ;;  %v84_v22 = vsub.f32 %v154_v15, %v167_v18 }
  0x97   :  { %v86_v23 = vsub.f32 %v158_v16, %v169_v21 }
  0x98   :  { %v88_v26 = vmul.f32 %v84_v22, %v84_v22  ;;  %v106_v27 = vand.u32 2147483647, %v84_v22 }
  0x99   :  { %v90_v32 = vmul.f32 %v86_v23, %v86_v23  ;;  %v108_v33 = vand.u32 2147483647, %v86_v23 }
  0x9a   :  { %v93_v30 = vsel %vm91_vm1, %v88_v26, 0.0  ;;  %v110_v31 = vsel %vm91_vm1, %v106_v27, 0.0 }
  0x9b   :  { %v94_v34 = vadd.f32 %v93_v30, %v92_v28  ;;  %v111_v35 = vadd.f32 %v110_v31, %v109_v29  ;;  %v97_v40 = vsel %vm91_vm1, %v90_v32, 0.0  ;;  %v114_v41 = vsel %vm91_vm1, %v108_v33, 0.0 }
  0x9d   :  { %v96_v38 = vadd.f32 %v95_v36, %v94_v34  ;;  %v113_v39 = vadd.f32 %v112_v37, %v111_v35 }
  0x9f   :  { %v98_v42 = vadd.f32 %v97_v40, %v96_v38  ;;  %v115_v43 = vadd.f32 %v114_v41, %v113_v39 }
  0xa1   :  { %v99_v44 = vrot.slane %v98_v42, 4  ;;  %v116_v45 = vrot.slane %v115_v43, 4 }
  0xa3   :  { %v100_v46 = vadd.f32 %v99_v44, %v98_v42  ;;  %v117_v47 = vadd.f32 %v116_v45, %v115_v43 }
  0xa5   :  { %v101_v48 = vrot.slane %v100_v46, 2  ;;  %v118_v49 = vrot.slane %v117_v47, 2 }
  0xa7   :  { %v102_v50 = vadd.f32 %v101_v48, %v100_v46  ;;  %v119_v51 = vadd.f32 %v118_v49, %v117_v47 }
  0xa9   :  { %v103_v52 = vrot.slane %v102_v50, 1  ;;  %v120_v53 = vrot.slane %v119_v51, 1 }
  0xab   :  { %v104_v54 = vadd.f32 %v103_v52, %v102_v50  ;;  %v121_v55 = vadd.f32 %v120_v53, %v119_v51 }
  0xad   :  { %123 = vst.msk [vmem:[%s225_s3] sm:$0x1] %vm122_vm2, %v104_v54 }
  0xae   :  { %124 = vst.msk [vmem:[%s225_s3 + $0x1] sm:$0x1] %vm122_vm2, %v121_v55 }

</bundles_post_ra>
